<compile_context>
chip_gen: v7x
topology: tpu7x:2x2x1
jax: 0.10.0
libtpu: 0.0.40
codegen_flags: <defaults>
</compile_context>

<pallas_src>
import jax
import jax.numpy as jnp
from jax import lax
from jax.experimental import pallas as pl
from jax.experimental.pallas import tpu as pltpu


def fczero_kernel(alpha_ref, h_ref, w_ref, b_ref, out_ref):
    """One grid step == one batch tile, all layers run in-kernel.

    alpha_ref : SMEM (deep,) f32            per-layer ReZero scalars
    h_ref     : VMEM (tb, D)                batch tile of activations
    w_ref     : VMEM (deep, D, D) bf16      weight stack, PyTorch (out, in) layout
    b_ref     : VMEM (deep, 1, D) f32       bias stack
    out_ref   : VMEM (tb, D)                output tile
    """
    deep = w_ref.shape[0]
    h0 = h_ref[...].astype(jnp.float32)

    def layer(d, h):
        # y = h @ W[d]^T  : contract h's dim 1 with W's "in" axis (dim 1).
        y = lax.dot_general(
            h.astype(jnp.bfloat16), w_ref[d],
            dimension_numbers=(((1,), (1,)), ((), ())),
            preferred_element_type=jnp.float32)            # (tb, D) f32
        y = y + b_ref[d]                                    # f32 bias (1, D) broadcast
        y = jnp.maximum(y, 0.0)                             # ReLU
        return h + alpha_ref[d] * y                         # ReZero update (f32 carry)

    h = lax.fori_loop(0, deep, layer, h0, unroll=True)
    out_ref[...] = h.astype(out_ref.dtype)


def fczero_forward(h, weights, biases, alphas):
    """h: (B, D); weights: (deep, D, D) in PyTorch (out, in) layout;
    biases: (deep, D); alphas: (deep,)."""
    B, D = h.shape
    deep = weights.shape[0]

    # Glue: bf16 weight stream (no transpose!), f32 bias/alphas.
    w = weights.astype(jnp.bfloat16)                     # (deep, D_out, D_in)
    b = biases.astype(jnp.float32).reshape(deep, 1, D)   # (deep, 1, D)
    a = alphas.astype(jnp.float32)

    # Batch tiling: whole batch in one block when small; 128/256-row tiles
    # (parallel axis -> both v7x TensorCores) when the batch is large.
    tb = B
    for cand in (256, 128):
        if B >= cand and B % cand == 0:
            tb = cand
            break
    grid = (B // tb,)

    flops = 2 * B * D * D * deep + 4 * B * D * deep
    bytes_accessed = 2 * deep * D * D + 4 * deep * D + 2 * 4 * B * D + 4 * deep

    return pl.pallas_call(
        fczero_kernel,
        out_shape=jax.ShapeDtypeStruct((B, D), h.dtype),
        grid_spec=pltpu.PrefetchScalarGridSpec(
            num_scalar_prefetch=0,
            grid=grid,
            in_specs=[
                pl.BlockSpec(memory_space=pltpu.SMEM),                 # alphas
                pl.BlockSpec((tb, D), lambda i: (i, 0)),               # h batch tile
                pl.BlockSpec((deep, D, D), lambda i: (0, 0, 0)),       # weight stack (resident)
                pl.BlockSpec((deep, 1, D), lambda i: (0, 0, 0)),       # bias stack (resident)
            ],
            out_specs=pl.BlockSpec((tb, D), lambda i: (i, 0)),
        ),
        compiler_params=pltpu.CompilerParams(
            dimension_semantics=("parallel",),   # batch tiles are independent
        ),
        cost_estimate=pl.CostEstimate(
            flops=flops, transcendentals=0, bytes_accessed=bytes_accessed),
    )(a, h, w, b)


def constructor_forward(x, weights, biases, alphas):
    """Constructor.forward with gauss_dim=None, scale_vec=None: return loc(x)."""
    return fczero_forward(x, weights, biases, alphas)


def fczero_reference_bf16(h, weights, biases, alphas):
    """Pure-JAX reference mirroring the kernel's precision (bf16 matmul, f32 acc)."""
    h = h.astype(jnp.float32)
    w = weights.astype(jnp.bfloat16)
    deep = weights.shape[0]
    for d in range(deep):
        y = lax.dot_general(
            h.astype(jnp.bfloat16), w[d],
            dimension_numbers=(((1,), (1,)), ((), ())),
            preferred_element_type=jnp.float32)
        y = y + biases[d].astype(jnp.float32)
        h = h + alphas[d] * jnp.maximum(y, 0.0)
    return h


def fczero_reference_f32(h, weights, biases, alphas):
    """Full-f32 reference matching the PyTorch forward semantics."""
    h = h.astype(jnp.float32)
    deep = weights.shape[0]
    for d in range(deep):
        y = h @ weights[d].T + biases[d]
        h = h + alphas[d] * jnp.maximum(y, 0.0)
    return h


if __name__ == "__main__":
    # Small shapes consistent with the module: dim=128 hidden, deep=4 layers,
    # batch=8 rows of activations.
    B, D, DEEP = 8, 128, 4

    key = jax.random.PRNGKey(0)
    k_h, k_w, k_b = jax.random.split(key, 3)

    h = jax.random.normal(k_h, (B, D), dtype=jnp.float32)
    # nn.Linear(dim, dim): weight (out=D, in=D), bias (D,)
    weights = jax.random.normal(k_w, (DEEP, D, D), dtype=jnp.float32) * (1.0 / jnp.sqrt(D))
    biases = jax.random.normal(k_b, (DEEP, D), dtype=jnp.float32) * 0.01
    # ReZero alphas: PyTorch inits to 0.0 (identity forward); use small
    # deterministic non-zero values so the compute path is non-trivial.
    alphas = jnp.array([0.1 * (i + 1) for i in range(DEEP)], dtype=jnp.float32)

    out = constructor_forward(h, weights, biases, alphas)
    out = jax.block_until_ready(out)
    assert out.shape == (B, D)

    # Exact-precision mirror (bf16 weights, f32 accumulation) — tight tolerance.
    ref_bf16 = fczero_reference_bf16(h, weights, biases, alphas)
    assert jnp.allclose(out, ref_bf16, atol=1e-3, rtol=1e-3), "mismatch vs bf16-mirror reference"

    # Full-f32 semantics of the PyTorch module — loose tolerance (bf16 weight stream).
    ref_f32 = fczero_reference_f32(h, weights, biases, alphas)
    assert jnp.allclose(out, ref_f32, atol=5e-2, rtol=5e-2), "mismatch vs f32 reference"

    print("KERNEL_OK")
</pallas_src>

<mosaic_0001>
module attributes {stable_mosaic.version = 11 : i64} {
  func.func @fczero_kernel(%arg0: i32, %arg1: memref<4xf32, #tpu.memory_space<smem>>, %arg2: memref<8x128xf32, #tpu.memory_space<vmem>>, %arg3: memref<4x128x128xbf16, #tpu.memory_space<vmem>>, %arg4: memref<4x1x128xf32, #tpu.memory_space<vmem>>, %arg5: memref<8x128xf32, #tpu.memory_space<vmem>>) attributes {dimension_semantics = [#tpu.dimension_semantics<parallel>], iteration_bounds = array<i64: 1>, scalar_prefetch = 0 : i64, scratch_operands = 0 : i64, tpu.core_type = #tpu.core_type<tc>, window_params = [{transform_indices = @transform_0, window_bounds = array<i64: 4>}, {transform_indices = @transform_1, window_bounds = array<i64: 8, 128>}, {pipeline_mode = #tpu.pipeline_mode<synchronous>, transform_indices = @transform_2, window_bounds = array<i64: 4, 128, 128>}, {pipeline_mode = #tpu.pipeline_mode<synchronous>, transform_indices = @transform_3, window_bounds = array<i64: 4, 1, 128>}, {transform_indices = @transform_4, window_bounds = array<i64: 8, 128>}]} {
    %c0 = arith.constant 0 : index
    %c0_0 = arith.constant 0 : index
    %0 = vector.load %arg2[%c0, %c0_0] : memref<8x128xf32, #tpu.memory_space<vmem>>, vector<8x128xf32>
    %c0_i32 = arith.constant 0 : i32
    %1 = arith.truncf %0 : vector<8x128xf32> to vector<8x128xbf16>
    %2 = arith.index_cast %c0_i32 : i32 to index
    %c0_1 = arith.constant 0 : index
    %c0_2 = arith.constant 0 : index
    %3 = vector.load %arg3[%2, %c0_1, %c0_2] : memref<4x128x128xbf16, #tpu.memory_space<vmem>>, vector<1x128x128xbf16>
    %4 = vector.shape_cast %3 : vector<1x128x128xbf16> to vector<128x128xbf16>
    %cst = arith.constant dense<0.000000e+00> : vector<8x128xf32>
    %5 = tpu.matmul %1, %4, %cst {dimension_numbers = #tpu.dot_dimension_numbers<[1], [1], [0], [0], [0, 0, 1, 0], [], []>} : vector<8x128xbf16>, vector<128x128xbf16>, vector<8x128xf32> -> vector<8x128xf32>
    %6 = arith.index_cast %c0_i32 : i32 to index
    %c0_3 = arith.constant 0 : index
    %c0_4 = arith.constant 0 : index
    %7 = vector.load %arg4[%6, %c0_3, %c0_4] : memref<4x1x128xf32, #tpu.memory_space<vmem>>, vector<1x1x128xf32>
    %8 = vector.shape_cast %7 : vector<1x1x128xf32> to vector<1x128xf32>
    %9 = vector.broadcast %8 : vector<1x128xf32> to vector<8x128xf32>
    %10 = arith.addf %5, %9 : vector<8x128xf32>
    %cst_5 = arith.constant 0.000000e+00 : f32
    %11 = vector.broadcast %cst_5 : f32 to vector<8x128xf32>
    %12 = arith.maximumf %10, %11 : vector<8x128xf32>
    %13 = arith.index_cast %c0_i32 : i32 to index
    %14 = memref.load %arg1[%13] : memref<4xf32, #tpu.memory_space<smem>>
    %15 = vector.broadcast %14 : f32 to vector<8x128xf32>
    %16 = arith.mulf %15, %12 : vector<8x128xf32>
    %17 = arith.addf %0, %16 : vector<8x128xf32>
    %c1_i32 = arith.constant 1 : i32
    %18 = arith.truncf %17 : vector<8x128xf32> to vector<8x128xbf16>
    %19 = arith.index_cast %c1_i32 : i32 to index
    %c0_6 = arith.constant 0 : index
    %c0_7 = arith.constant 0 : index
    %20 = vector.load %arg3[%19, %c0_6, %c0_7] : memref<4x128x128xbf16, #tpu.memory_space<vmem>>, vector<1x128x128xbf16>
    %21 = vector.shape_cast %20 : vector<1x128x128xbf16> to vector<128x128xbf16>
    %cst_8 = arith.constant dense<0.000000e+00> : vector<8x128xf32>
    %22 = tpu.matmul %18, %21, %cst_8 {dimension_numbers = #tpu.dot_dimension_numbers<[1], [1], [0], [0], [0, 0, 1, 0], [], []>} : vector<8x128xbf16>, vector<128x128xbf16>, vector<8x128xf32> -> vector<8x128xf32>
    %23 = arith.index_cast %c1_i32 : i32 to index
    %c0_9 = arith.constant 0 : index
    %c0_10 = arith.constant 0 : index
    %24 = vector.load %arg4[%23, %c0_9, %c0_10] : memref<4x1x128xf32, #tpu.memory_space<vmem>>, vector<1x1x128xf32>
    %25 = vector.shape_cast %24 : vector<1x1x128xf32> to vector<1x128xf32>
    %26 = vector.broadcast %25 : vector<1x128xf32> to vector<8x128xf32>
    %27 = arith.addf %22, %26 : vector<8x128xf32>
    %cst_11 = arith.constant 0.000000e+00 : f32
    %28 = vector.broadcast %cst_11 : f32 to vector<8x128xf32>
    %29 = arith.maximumf %27, %28 : vector<8x128xf32>
    %30 = arith.index_cast %c1_i32 : i32 to index
    %31 = memref.load %arg1[%30] : memref<4xf32, #tpu.memory_space<smem>>
    %32 = vector.broadcast %31 : f32 to vector<8x128xf32>
    %33 = arith.mulf %32, %29 : vector<8x128xf32>
    %34 = arith.addf %17, %33 : vector<8x128xf32>
    %c2_i32 = arith.constant 2 : i32
    %35 = arith.truncf %34 : vector<8x128xf32> to vector<8x128xbf16>
    %36 = arith.index_cast %c2_i32 : i32 to index
    %c0_12 = arith.constant 0 : index
    %c0_13 = arith.constant 0 : index
    %37 = vector.load %arg3[%36, %c0_12, %c0_13] : memref<4x128x128xbf16, #tpu.memory_space<vmem>>, vector<1x128x128xbf16>
    %38 = vector.shape_cast %37 : vector<1x128x128xbf16> to vector<128x128xbf16>
    %cst_14 = arith.constant dense<0.000000e+00> : vector<8x128xf32>
    %39 = tpu.matmul %35, %38, %cst_14 {dimension_numbers = #tpu.dot_dimension_numbers<[1], [1], [0], [0], [0, 0, 1, 0], [], []>} : vector<8x128xbf16>, vector<128x128xbf16>, vector<8x128xf32> -> vector<8x128xf32>
    %40 = arith.index_cast %c2_i32 : i32 to index
    %c0_15 = arith.constant 0 : index
    %c0_16 = arith.constant 0 : index
    %41 = vector.load %arg4[%40, %c0_15, %c0_16] : memref<4x1x128xf32, #tpu.memory_space<vmem>>, vector<1x1x128xf32>
    %42 = vector.shape_cast %41 : vector<1x1x128xf32> to vector<1x128xf32>
    %43 = vector.broadcast %42 : vector<1x128xf32> to vector<8x128xf32>
    %44 = arith.addf %39, %43 : vector<8x128xf32>
    %cst_17 = arith.constant 0.000000e+00 : f32
    %45 = vector.broadcast %cst_17 : f32 to vector<8x128xf32>
    %46 = arith.maximumf %44, %45 : vector<8x128xf32>
    %47 = arith.index_cast %c2_i32 : i32 to index
    %48 = memref.load %arg1[%47] : memref<4xf32, #tpu.memory_space<smem>>
    %49 = vector.broadcast %48 : f32 to vector<8x128xf32>
    %50 = arith.mulf %49, %46 : vector<8x128xf32>
    %51 = arith.addf %34, %50 : vector<8x128xf32>
    %c3_i32 = arith.constant 3 : i32
    %52 = arith.truncf %51 : vector<8x128xf32> to vector<8x128xbf16>
    %53 = arith.index_cast %c3_i32 : i32 to index
    %c0_18 = arith.constant 0 : index
    %c0_19 = arith.constant 0 : index
    %54 = vector.load %arg3[%53, %c0_18, %c0_19] : memref<4x128x128xbf16, #tpu.memory_space<vmem>>, vector<1x128x128xbf16>
    %55 = vector.shape_cast %54 : vector<1x128x128xbf16> to vector<128x128xbf16>
    %cst_20 = arith.constant dense<0.000000e+00> : vector<8x128xf32>
    %56 = tpu.matmul %52, %55, %cst_20 {dimension_numbers = #tpu.dot_dimension_numbers<[1], [1], [0], [0], [0, 0, 1, 0], [], []>} : vector<8x128xbf16>, vector<128x128xbf16>, vector<8x128xf32> -> vector<8x128xf32>
    %57 = arith.index_cast %c3_i32 : i32 to index
    %c0_21 = arith.constant 0 : index
    %c0_22 = arith.constant 0 : index
    %58 = vector.load %arg4[%57, %c0_21, %c0_22] : memref<4x1x128xf32, #tpu.memory_space<vmem>>, vector<1x1x128xf32>
    %59 = vector.shape_cast %58 : vector<1x1x128xf32> to vector<1x128xf32>
    %60 = vector.broadcast %59 : vector<1x128xf32> to vector<8x128xf32>
    %61 = arith.addf %56, %60 : vector<8x128xf32>
    %cst_23 = arith.constant 0.000000e+00 : f32
    %62 = vector.broadcast %cst_23 : f32 to vector<8x128xf32>
    %63 = arith.maximumf %61, %62 : vector<8x128xf32>
    %64 = arith.index_cast %c3_i32 : i32 to index
    %65 = memref.load %arg1[%64] : memref<4xf32, #tpu.memory_space<smem>>
    %66 = vector.broadcast %65 : f32 to vector<8x128xf32>
    %67 = arith.mulf %66, %63 : vector<8x128xf32>
    %68 = arith.addf %51, %67 : vector<8x128xf32>
    %c4_i32 = arith.constant 4 : i32
    %c0_24 = arith.constant 0 : index
    %c0_25 = arith.constant 0 : index
    %69 = vector.load %arg5[%c0_24, %c0_25] : memref<8x128xf32, #tpu.memory_space<vmem>>, vector<8x128xf32>
    tpu.vector_store %arg5[%c0_24, %c0_25], %68 {strides = array<i32>} : memref<8x128xf32, #tpu.memory_space<vmem>>, vector<8x128xf32>,
    return
  }
  func.func @transform_0(%arg0: i32) -> i32 {
    %c0_i32 = arith.constant 0 : i32
    %c0_i32_0 = arith.constant 0 : i32
    return %c0_i32 : i32
  }
  func.func @transform_1(%arg0: i32) -> (i32, i32) {
    %c0_i32 = arith.constant 0 : i32
    %c0_i32_0 = arith.constant 0 : i32
    return %arg0, %c0_i32 : i32, i32
  }
  func.func @transform_2(%arg0: i32) -> (i32, i32, i32) {
    %c0_i32 = arith.constant 0 : i32
    %c0_i32_0 = arith.constant 0 : i32
    %c0_i32_1 = arith.constant 0 : i32
    %c0_i32_2 = arith.constant 0 : i32
    return %c0_i32, %c0_i32_0, %c0_i32_1 : i32, i32, i32
  }
  func.func @transform_3(%arg0: i32) -> (i32, i32, i32) {
    %c0_i32 = arith.constant 0 : i32
    %c0_i32_0 = arith.constant 0 : i32
    %c0_i32_1 = arith.constant 0 : i32
    %c0_i32_2 = arith.constant 0 : i32
    return %c0_i32, %c0_i32_0, %c0_i32_1 : i32, i32, i32
  }
  func.func @transform_4(%arg0: i32) -> (i32, i32) {
    %c0_i32 = arith.constant 0 : i32
    %c0_i32_0 = arith.constant 0 : i32
    return %arg0, %c0_i32 : i32, i32
  }
}

</mosaic_0001>

<bundles_post_ra>
// kernel: tpu_custom_call.1
= control target key start
LH: loop header
LB: loop body
LE: loop exit
PB: predicated region body
PF: predicated region fallthrough
CT: control target
= control target key end

     0   :  { %9 = vsyncpa [#allocation5], 0  ;;  %s964_s0 = inlined_call_operand.hbm [shape: f32[4], index: 0, kind: input, shape index: {}]   ;;  %s965_s1 = inlined_call_operand.hbm [shape: f32[8,128], index: 1, kind: input, shape index: {}]   ;;  %s966_s2 = inlined_call_operand.hbm [shape: bf16[4,128,128], index: 2, kind: input, shape index: {}]   ;;  %s967_s3 = inlined_call_operand.vmem [shape: f32[4,1,128], index: 3, kind: input, shape index: {}]   ;;  %s968_s4 = inlined_call_operand.hbm [shape: f32[8,128], index: 4, kind: output, shape index: {}]  }
   0x1   :  { %10 = vsyncpa [#allocation3], 0 }
   0x2   :  { %11 = vsyncpa [#allocation8], 0 }
   0x3   :  { %12 = vsyncpa [#allocation4], 0  ;;  %s747_s17 = scalar_lea.hbm %s964_s0, 16 }
   0x4   :  { %p748_p0 = scmp.ne.s32.totalorder %s964_s0, %s747_s17  ;;  %p751_p1 = scmp.lt.u32.totalorder %s747_s17, %s964_s0 }
   0x6   :  { %p753_p2 = pnand %p751_p1, %p748_p0 }
   0x8   :  { %756 = shalt.err (!%p753_p2)
}
   0x9   :  { %s831_s22 = smov [#allocation2]   ;;  %s832_s25 = smov [#allocation6]  }
   0xa   :  { %20 = dma.hbm_to_smem %s964_s0, 16, %s831_s22, [#allocation5]  }
   0xb   :  { %s27_s26 = sshll.u32 %s832_s25, 4  ;;  %s833_s27 = smov [#allocation7]   ;;  %s28_s26 = int_to_ptr.vmem [resolvable:$true] %s27_s26 }
   0xc   :  { %s36_s28 = sshll.u32 %s833_s27, 4  ;;  %s757_s5 = scalar_lea.hbm %s965_s1, 128  ;;  %s37_s28 = int_to_ptr.vmem [resolvable:$true] %s36_s28 }
   0xd   :  { %p758_p3 = scmp.ne.s32.totalorder %s965_s1, %s757_s5  ;;  %p761_p4 = scmp.lt.u32.totalorder %s757_s5, %s965_s1 }
   0xf   :  { %p763_p5 = pnand %p761_p4, %p758_p3 }
  0x11   :  { %766 = shalt.err (!%p763_p5)
}
  0x12   :  { %s767_s0 = scalar_lea.vmem %s28_s26, 128  ;;  %p772_p7 = scmp.lt.s32.totalorder %s28_s26, %s28_s26 }
  0x13   :  { %p768_p6 = scmp.ne.s32.totalorder %s28_s26, %s767_s0  ;;  %p773_p8 = scmp.lt.s32.totalorder %s767_s0, %s767_s0 }
  0x15   :  { %p774_p9 = por %p773_p8, %p772_p7 }
  0x17   :  { %p775_p10 = pnand %p774_p9, %p768_p6 }
  0x19   :  { %778 = shalt.err (!%p775_p10)
}
  0x1a   :  { %30 = dma.hbm_to_vmem [thread:$0]  %s965_s1, 128, %s28_s26, [#allocation3]  }
  0x1b   :  { %s779_s14 = scalar_lea.hbm %s966_s2, 4096 }
  0x1c   :  { %p780_p11 = scmp.ne.s32.totalorder %s966_s2, %s779_s14  ;;  %p783_p12 = scmp.lt.u32.totalorder %s779_s14, %s966_s2 }
  0x1e   :  { %p785_p13 = pnand %p783_p12, %p780_p11 }
  0x20   :  { %788 = shalt.err (!%p785_p13)
}
  0x21   :  { %s789_s19 = scalar_lea.vmem %s37_s28, 4096  ;;  %p794_p1 = scmp.lt.s32.totalorder %s37_s28, %s37_s28 }
  0x22   :  { %p790_p0 = scmp.ne.s32.totalorder %s37_s28, %s789_s19  ;;  %p795_p2 = scmp.lt.s32.totalorder %s789_s19, %s789_s19 }
  0x24   :  { %p796_p3 = por %p795_p2, %p794_p1 }
  0x26   :  { %p797_p4 = pnand %p796_p3, %p790_p0 }
  0x28   :  { %800 = shalt.err (!%p797_p4)
}
  0x29   :  { %s834_s1 = smov 64   ;;  %s835_s20 = smov 4  }
  0x2a   :  { %42 = dma.hbm_to_vmem [thread:$0]  %s966_s2, 4096, %s37_s28, [#allocation8], %s834_s1, %s834_s1, %s835_s20  }
  0x2b   :  { %823 = dma.done.wait [#allocation5], 16  }
  0x2c   :  { %824 = vsyncadd [#allocation5], 4294967280 }
  0x2d   :  { %825 = dma.done.wait [#allocation3], 128  }
  0x2e   :  { %826 = vsyncadd [#allocation3], 4294967168 }
  0x2f   :  { %827 = dma.done.wait [#allocation8], 4096  }
  0x30   :  { %828 = vsyncadd [#allocation8], 4294963200 }
  0x31   :  { %54 = sfence }
  0x32   :  { %v715_v0 = vld [vmem:[#allocation7] sm:$0xff]   ;;  %v836_v1 = vmov 0.0   ;;  %vm837_vm0 = vmmov 0   ;;  %v716_v2 = vld [vmem:[#allocation7 + $0x8] sm:$0xff]   ;;  %v717_v4 = vld [vmem:[#allocation7 + $0x10] sm:$0xff]   ;;  %s170_s2 = sld [smem:[#allocation2]] }
  0x33   :  { %627 = vmatprep.subr.bf16.mxu0 %v836_v1  ;;  %647 = vmatprep.subr.bf16.mxu1 %v836_v1  ;;  %v723_v3 = vld [vmem:[#allocation7 + $0x40] sm:$0xff]   ;;  %v724_v5 = vld [vmem:[#allocation7 + $0x48] sm:$0xff]   ;;  %v718_v6 = vld [vmem:[#allocation7 + $0x18] sm:$0xff]   ;;  %s568_s25 = sld [smem:[#allocation2 + $0x1]]  ;;  %s579_s28 = sld [smem:[#allocation2 + $0x2]] }
  0x34   :  { %628 = vmatpush3.bf16.xpose.msra.mxu0 %v715_v0  ;;  %643 = vmatprep.mubr.msk.bf16.mxu0 %vm837_vm0, %v836_v1  ;;  %v725_v7 = vld [vmem:[#allocation7 + $0x50] sm:$0xff]   ;;  %v719_v8 = vld [vmem:[#allocation7 + $0x20] sm:$0xff]   ;;  %v726_v9 = vld [vmem:[#allocation7 + $0x58] sm:$0xff]   ;;  %s590_s5 = sld [smem:[#allocation2 + $0x3]]  ;;  %s838_s8 = smov [#allocation9]  }
  0x35   :  { %629 = vmatprep.subr.bf16.mxu0 %v836_v1  ;;  %663 = vmatprep.mubr.msk.bf16.mxu1 %vm837_vm0, %v836_v1  ;;  %v720_v10 = vld [vmem:[#allocation7 + $0x28] sm:$0xff]   ;;  %v727_v11 = vld [vmem:[#allocation7 + $0x60] sm:$0xff]   ;;  %v721_v12 = vld [vmem:[#allocation7 + $0x30] sm:$0xff]   ;;  %s538_s9 = sshll.u32 %s838_s8, 4  ;;  %s539_s9 = int_to_ptr.vmem [resolvable:$true] %s538_s9 }
  0x36   :  { %648 = vmatpush3.bf16.xpose.msra.mxu1 %v723_v3  ;;  %v728_v13 = vld [vmem:[#allocation7 + $0x68] sm:$0xff]   ;;  %v722_v14 = vld [vmem:[#allocation7 + $0x38] sm:$0xff]   ;;  %v729_v15 = vld [vmem:[#allocation7 + $0x70] sm:$0xff]   ;;  %s801_s0 = scalar_lea.vmem %s539_s9, 128  ;;  %p806_p6 = scmp.lt.s32.totalorder %s539_s9, %s539_s9 }
  0x37   :  { %649 = vmatprep.subr.bf16.mxu1 %v836_v1  ;;  %v56_v16 = vld [vmem:[#allocation6] sm:$0xff]  ;;  %v731_v19 = vld [vmem:[#allocation7 + $0x80] sm:$0xff]   ;;  %v732_v20 = vld [vmem:[#allocation7 + $0x88] sm:$0xff]   ;;  %p802_p5 = scmp.ne.s32.totalorder %s539_s9, %s801_s0  ;;  %p807_p7 = scmp.lt.s32.totalorder %s801_s0, %s801_s0 }
  0x38   :  { %v57_v17 = vpack.c.bf16 %v56_v16, %v56_v16  ;;  %v730_v18 = vld [vmem:[#allocation7 + $0x78] sm:$0xff]   ;;  %v733_v21 = vld [vmem:[#allocation7 + $0x90] sm:$0xff]   ;;  %v735_v23 = vld [vmem:[#allocation7 + $0xa0] sm:$0xff]   ;;  %v171_v30 = vstv %s170_s2 }
  0x39   :  { %v734_v22 = vld [vmem:[#allocation7 + $0x98] sm:$0xff]   ;;  %v736_v24 = vld [vmem:[#allocation7 + $0xa8] sm:$0xff]   ;;  %v737_v25 = vld [vmem:[#allocation7 + $0xb0] sm:$0xff]   ;;  %v290_v49 = vstv %s568_s25  ;;  %v409_v61 = vstv %s579_s28  ;;  %p808_p8 = por %p807_p7, %p806_p6 }
  0x3a   :  { %v549_v26 = vld [vmem:[%s967_s3] ss:$0 sm:$0xff]  ;;  %v738_v37 = vld [vmem:[#allocation7 + $0xb8] sm:$0xff]   ;;  %v739_v38 = vld [vmem:[#allocation7 + $0xc0] sm:$0xff]  }
  0x3b   :  { %v740_v39 = vld [vmem:[#allocation7 + $0xc8] sm:$0xff]   ;;  %v741_v40 = vld [vmem:[#allocation7 + $0xd0] sm:$0xff]   ;;  %v742_v41 = vld [vmem:[#allocation7 + $0xd8] sm:$0xff]   ;;  %p809_p9 = pnand %p808_p8, %p802_p5 }
  0x3c   :  { %630 = vmatpush3.bf16.xpose.msra.mxu0 %v716_v2  ;;  %v743_v42 = vld [vmem:[#allocation7 + $0xe0] sm:$0xff]   ;;  %v744_v43 = vld [vmem:[#allocation7 + $0xe8] sm:$0xff]   ;;  %v745_v44 = vld [vmem:[#allocation7 + $0xf0] sm:$0xff]  }
  0x3d   :  { %631 = vmatprep.subr.bf16.mxu0 %v836_v1  ;;  %v559_v45 = vld [vmem:[%s967_s3 + $0x1] ss:$0 sm:$0xff]  ;;  %v746_v56 = vld [vmem:[#allocation7 + $0xf8] sm:$0xff]   ;;  %v570_v57 = vld [vmem:[%s967_s3 + $0x2] ss:$0 sm:$0xff] }
  0x3e   :  { %650 = vmatpush3.bf16.xpose.msra.mxu1 %v724_v5 }
  0x3f   :  { %651 = vmatprep.subr.bf16.mxu1 %v836_v1 }
  0x44   :  { %632 = vmatpush3.bf16.xpose.msra.mxu0 %v717_v4  ;;  %v581_v4 = vld [vmem:[%s967_s3 + $0x3] ss:$0 sm:$0xff] }
  0x45   :  { %633 = vmatprep.subr.bf16.mxu0 %v836_v1 }
  0x46   :  { %652 = vmatpush3.bf16.xpose.msra.mxu1 %v725_v7 }
  0x47   :  { %653 = vmatprep.subr.bf16.mxu1 %v836_v1 }
  0x4c   :  { %634 = vmatpush3.bf16.xpose.msra.mxu0 %v718_v6 }
  0x4d   :  { %635 = vmatprep.subr.bf16.mxu0 %v836_v1 }
  0x4e   :  { %654 = vmatpush3.bf16.xpose.msra.mxu1 %v726_v9  ;;  %v528_v9 = vstv %s590_s5 }
  0x4f   :  { %655 = vmatprep.subr.bf16.mxu1 %v836_v1 }
  0x54   :  { %636 = vmatpush3.bf16.xpose.msra.mxu0 %v719_v8 }
  0x55   :  { %637 = vmatprep.subr.bf16.mxu0 %v836_v1 }
  0x56   :  { %656 = vmatpush3.bf16.xpose.msra.mxu1 %v727_v11 }
  0x57   :  { %657 = vmatprep.subr.bf16.mxu1 %v836_v1 }
  0x5c   :  { %638 = vmatpush3.bf16.xpose.msra.mxu0 %v720_v10 }
  0x5d   :  { %639 = vmatprep.subr.bf16.mxu0 %v836_v1 }
  0x5e   :  { %658 = vmatpush3.bf16.xpose.msra.mxu1 %v728_v13 }
  0x5f   :  { %659 = vmatprep.subr.bf16.mxu1 %v836_v1 }
  0x64   :  { %640 = vmatpush3.bf16.xpose.msra.mxu0 %v721_v12 }
  0x65   :  { %641 = vmatprep.subr.bf16.mxu0 %v836_v1 }
  0x66   :  { %660 = vmatpush3.bf16.xpose.msra.mxu1 %v729_v15 }
  0x67   :  { %661 = vmatprep.subr.bf16.mxu1 %v836_v1 }
  0x6c   :  { %642 = vmatpush3.bf16.xpose.msra.mxu0 %v722_v14 }
  0x6d   :  { %667 = vmatprep.subr.bf16.mxu0 %v836_v1 }
  0x6e   :  { %662 = vmatpush3.bf16.xpose.msra.mxu1 %v730_v18 }
  0x6f   :  { %687 = vmatprep.subr.bf16.mxu1 %v836_v1 }
  0x73   :  { %644 = vmatmul.mubr.bf16.vlgmr.msra.gmra.mrb[0].mxu0 %v57_v17 }
  0x74   :  { %683 = vmatprep.mubr.msk.bf16.mxu0 %vm837_vm0, %v836_v1  ;;  %668 = vmatpush3.bf16.xpose.msra.mxu0 %v731_v19 }
  0x75   :  { %669 = vmatprep.subr.bf16.mxu0 %v836_v1 }
  0x7c   :  { %670 = vmatpush3.bf16.xpose.msra.mxu0 %v732_v20 }
  0x7d   :  { %671 = vmatprep.subr.bf16.mxu0 %v836_v1 }
  0x84   :  { %672 = vmatpush3.bf16.xpose.msra.mxu0 %v733_v21 }
  0x85   :  { %673 = vmatprep.subr.bf16.mxu0 %v836_v1 }
  0x8c   :  { %674 = vmatpush3.bf16.xpose.msra.mxu0 %v734_v22 }
  0x8d   :  { %675 = vmatprep.subr.bf16.mxu0 %v836_v1 }
  0x94   :  { %676 = vmatpush3.bf16.xpose.msra.mxu0 %v735_v23 }
  0x95   :  { %677 = vmatprep.subr.bf16.mxu0 %v836_v1 }
  0x9c   :  { %678 = vmatpush3.bf16.xpose.msra.mxu0 %v736_v24 }
  0x9d   :  { %679 = vmatprep.subr.bf16.mxu0 %v836_v1 }
  0xa4   :  { %680 = vmatpush3.bf16.xpose.msra.mxu0 %v737_v25 }
  0xa5   :  { %681 = vmatprep.subr.bf16.mxu0 %v836_v1 }
  0xac   :  { %682 = vmatpush3.bf16.xpose.msra.mxu0 %v738_v37 }
 0x146   :  { %v163_v27 = vpop.f32.mrb[0].mxu0 }
 0x147   :  { %v164_v28 = vadd.f32 %v549_v26, %v163_v27  ;;  %v645_v29 = vpop.f32.mrb[1].mxu0 }
 0x148   :  { %v166_v31 = vpop.f32.mrb[2].mxu0 }
 0x149   :  { %v169_v32 = vmax.f32 %v164_v28, 0.0  ;;  %v646_v33 = vpop.f32.mrb[3].mxu0 }
 0x14b   :  { %v172_v34 = vmul.f32 %v171_v30, %v169_v32 }
 0x14d   :  { %v173_v35 = vadd.f32 %v172_v34, %v56_v16 }
 0x14f   :  { %v174_v36 = vpack.c.bf16 %v173_v35, %v173_v35 }
 0x151   :  { %664 = vmatmul.mubr.bf16.vlgmr.msra.gmra.mrb[0].mxu1 %v174_v36 }
 0x152   :  { %703 = vmatprep.mubr.msk.bf16.mxu1 %vm837_vm0, %v836_v1  ;;  %688 = vmatpush3.bf16.xpose.msra.mxu1 %v739_v38 }
 0x153   :  { %689 = vmatprep.subr.bf16.mxu1 %v836_v1 }
 0x15a   :  { %690 = vmatpush3.bf16.xpose.msra.mxu1 %v740_v39 }
 0x15b   :  { %691 = vmatprep.subr.bf16.mxu1 %v836_v1 }
 0x162   :  { %692 = vmatpush3.bf16.xpose.msra.mxu1 %v741_v40 }
 0x163   :  { %693 = vmatprep.subr.bf16.mxu1 %v836_v1 }
 0x16a   :  { %694 = vmatpush3.bf16.xpose.msra.mxu1 %v742_v41 }
 0x16b   :  { %695 = vmatprep.subr.bf16.mxu1 %v836_v1 }
 0x172   :  { %696 = vmatpush3.bf16.xpose.msra.mxu1 %v743_v42 }
 0x173   :  { %697 = vmatprep.subr.bf16.mxu1 %v836_v1 }
 0x17a   :  { %698 = vmatpush3.bf16.xpose.msra.mxu1 %v744_v43 }
 0x17b   :  { %699 = vmatprep.subr.bf16.mxu1 %v836_v1 }
 0x182   :  { %700 = vmatpush3.bf16.xpose.msra.mxu1 %v745_v44 }
 0x183   :  { %701 = vmatprep.subr.bf16.mxu1 %v836_v1 }
 0x18a   :  { %702 = vmatpush3.bf16.xpose.msra.mxu1 %v746_v56 }
 0x224   :  { %v282_v46 = vpop.f32.mrb[0].mxu1 }
 0x225   :  { %v283_v47 = vadd.f32 %v559_v45, %v282_v46  ;;  %v665_v48 = vpop.f32.mrb[1].mxu1 }
 0x226   :  { %v285_v50 = vpop.f32.mrb[2].mxu1 }
 0x227   :  { %v288_v51 = vmax.f32 %v283_v47, 0.0  ;;  %v666_v52 = vpop.f32.mrb[3].mxu1 }
 0x229   :  { %v291_v53 = vmul.f32 %v290_v49, %v288_v51 }
 0x22b   :  { %v292_v54 = vadd.f32 %v291_v53, %v173_v35 }
 0x22d   :  { %v293_v55 = vpack.c.bf16 %v292_v54, %v292_v54 }
 0x22f   :  { %684 = vmatmul.mubr.bf16.vlgmr.msra.gmra.mrb[4].mxu0 %v293_v55 }
 0x302   :  { %v401_v58 = vpop.f32.mrb[4].mxu0 }
 0x303   :  { %v402_v59 = vadd.f32 %v570_v57, %v401_v58  ;;  %v685_v60 = vpop.f32.mrb[5].mxu0 }
 0x304   :  { %v404_v62 = vpop.f32.mrb[6].mxu0 }
 0x305   :  { %v407_v63 = vmax.f32 %v402_v59, 0.0  ;;  %v686_v0 = vpop.f32.mrb[7].mxu0 }
 0x307   :  { %v410_v1 = vmul.f32 %v409_v61, %v407_v63 }
 0x309   :  { %v411_v2 = vadd.f32 %v410_v1, %v292_v54 }
 0x30b   :  { %v412_v3 = vpack.c.bf16 %v411_v2, %v411_v2 }
 0x30d   :  { %704 = vmatmul.mubr.bf16.vlgmr.msra.gmra.mrb[4].mxu1 %v412_v3 }
 0x3e0   :  { %v520_v5 = vpop.f32.mrb[4].mxu1 }
 0x3e1   :  { %v521_v6 = vadd.f32 %v581_v4, %v520_v5  ;;  %v705_v7 = vpop.f32.mrb[5].mxu1 }
 0x3e2   :  { %v523_v8 = vpop.f32.mrb[6].mxu1 }
 0x3e3   :  { %v526_v10 = vmax.f32 %v521_v6, 0.0  ;;  %v706_v11 = vpop.f32.mrb[7].mxu1 }
 0x3e5   :  { %v529_v12 = vmul.f32 %v528_v9, %v526_v10 }
 0x3e7   :  { %v530_v13 = vadd.f32 %v529_v12, %v411_v2 }
 0x3e9   :  { %531 = vst [vmem:[#allocation9] sm:$0xff] %v530_v13 }
 0x3ea   :  { %812 = shalt.err (!%p809_p9)
}
 0x3eb   :  { %s813_s11 = scalar_lea.hbm %s968_s4, 128 }
 0x3ec   :  { %p814_p10 = scmp.ne.s32.totalorder %s968_s4, %s813_s11  ;;  %p817_p11 = scmp.lt.u32.totalorder %s813_s11, %s968_s4 }
 0x3ee   :  { %p819_p12 = pnand %p817_p11, %p814_p10 }
 0x3f0   :  { %822 = shalt.err (!%p819_p12)
}
 0x3f1   :  { %541 = dma.vmem_to_hbm [thread:$0]  %s539_s9, 128, %s968_s4, [#allocation4]  }
 0x3f2   :  { %829 = dma.done.wait [#allocation4], 128  }
 0x3f3   :  { %830 = vsyncadd [#allocation4], 4294967168 }
 0x3f4   :  { %545 = vsyncpa [#allocation3], 1 }
 0x3f5   :  { %546 = vsyncpa [#allocation8], 1 }
 0x3f6   :  { %547 = vsyncpa [#allocation4], 1 }
 0x3f7   :  { %548 = vsyncpa [#allocation5], 1 }

</bundles_post_ra>
